<compile_context>
chip_gen: v6e
topology: v6e:2x2x1
jax: 0.10.0
libtpu: 0.0.40
codegen_flags: <defaults>
</compile_context>

<pallas_src>
import jax
import jax.numpy as jnp
from jax import lax
from jax.experimental import pallas as pl
from jax.experimental.pallas import tpu as pltpu


def _round_up(x, m):
    return ((x + m - 1) // m) * m


def _diffusion_step_kernel(idx_ref, w_ref, x_ref, o_ref, acc_ref):
    """One edge-tile of the weighted gather / scatter-add.

    idx_ref : (2, tE) int32  row 0 = src (aggregation index), row 1 = dst (gather index)
    w_ref   : (1, tE) f32    edge weights (0 on padded edges)
    x_ref   : (Fp, Np)       node features, transposed & padded, resident across steps
    o_ref   : (Fp, Np)       output (same block every grid step)
    acc_ref : (Fp, Np) f32   VMEM accumulator scratch
    """
    e_step = pl.program_id(0)

    @pl.when(e_step == 0)
    def _():
        acc_ref[...] = jnp.zeros_like(acc_ref)

    src = idx_ref[0:1, :]                            # (1, tE) int32
    dst = idx_ref[1:2, :]                            # (1, tE) int32
    w = w_ref[...].astype(jnp.float32)               # (1, tE) f32
    x_t = x_ref[...].astype(jnp.float32)             # (Fp, Np) f32

    n_pad = x_ref.shape[1]
    t_e = w_ref.shape[1]

    # Node-id iota varying along the sublane axis -> (Np, tE).
    node_ids = lax.broadcasted_iota(jnp.int32, (n_pad, t_e), 0)

    # Gather one-hot with the edge weight folded in: Dw[n, e] = w[e] * [dst[e] == n].
    d_w = jnp.where(dst == node_ids, w, jnp.float32(0.0))               # (Np, tE)

    # gathered_w[f, e] = w[e] * x[dst[e], f]   (MXU)
    gathered_w = jnp.dot(x_t, d_w, preferred_element_type=jnp.float32)  # (Fp, tE)

    # Scatter one-hot: S[n, e] = [src[e] == n]; contract over the edge axis
    # (A @ B^T form -> no in-kernel transpose / relayout needed).
    s = (src == node_ids).astype(jnp.float32)                           # (Np, tE)
    contrib = lax.dot_general(
        gathered_w, s,
        dimension_numbers=(((1,), (1,)), ((), ())),
        preferred_element_type=jnp.float32,
    )                                                                   # (Fp, Np)

    acc_ref[...] += contrib

    @pl.when(e_step == pl.num_programs(0) - 1)
    def _():
        o_ref[...] = acc_ref[...].astype(o_ref.dtype)


def diffusion_step(x, edge_index, edge_weight=None, *, edge_tile=None):
    """x: (N, F) float, edge_index: (2, E) int, edge_weight: (E,) float or None."""
    N, F = x.shape
    E = edge_index.shape[1]

    # Lane-dense node axis, sublane-padded feature axis.
    n_pad = _round_up(max(N, 1), 128)
    f_pad = _round_up(max(F, 1), 8)

    # Edge tile: multiple of 128, capped by a VMEM budget for the two (Np, tE) f32
    # one-hot tiles and by the (padded) edge count.
    if edge_tile is None:
        budget_bytes = 4 * 1024 * 1024
        cap = max(128, (budget_bytes // (8 * n_pad)) // 128 * 128)
        edge_tile = max(128, min(1024, cap, _round_up(max(E, 1), 128)))
    t_e = edge_tile
    e_pad = _round_up(max(E, 1), t_e)

    # Packed lane-dense (2, E_pad) endpoint slab + (1, E_pad) weight row; padded edges
    # carry weight 0 so they contribute nothing regardless of their (zeroed) indices.
    idx = jnp.zeros((2, e_pad), jnp.int32)
    idx = idx.at[0, :E].set(edge_index[0].astype(jnp.int32))   # src (aggregation)
    idx = idx.at[1, :E].set(edge_index[1].astype(jnp.int32))   # dst (gather)
    if edge_weight is None:
        w_vals = jnp.ones((E,), jnp.float32)
    else:
        w_vals = edge_weight.astype(jnp.float32)               # keep weights f32 end-to-end
    w = jnp.zeros((1, e_pad), jnp.float32).at[0, :E].set(w_vals)

    # Node features transposed to (Fp, Np) so the node axis is lane-dense.
    x_t = jnp.zeros((f_pad, n_pad), x.dtype).at[:F, :N].set(x.T)

    grid = (e_pad // t_e,)

    out_t = pl.pallas_call(
        _diffusion_step_kernel,
        out_shape=jax.ShapeDtypeStruct((f_pad, n_pad), x.dtype),
        grid=grid,
        in_specs=[
            pl.BlockSpec((2, t_e), lambda e: (0, e)),          # src/dst endpoints
            pl.BlockSpec((1, t_e), lambda e: (0, e)),          # edge weights
            pl.BlockSpec((f_pad, n_pad), lambda e: (0, 0)),    # x, resident across tiles
        ],
        out_specs=pl.BlockSpec((f_pad, n_pad), lambda e: (0, 0)),
        scratch_shapes=[pltpu.VMEM((f_pad, n_pad), jnp.float32)],
        compiler_params=pltpu.CompilerParams(
            dimension_semantics=("arbitrary",),                # edge axis is a reduction
            vmem_limit_bytes=32 * 1024 * 1024,
        ),
    )(idx, w, x_t)

    return out_t[:F, :N].T


def _reference(x, edge_index, edge_weight):
    # Pure-JAX reference of the same scatter-add semantics.
    src = edge_index[0]
    dst = edge_index[1]
    if edge_weight is None:
        w = jnp.ones((edge_index.shape[1],), x.dtype)
    else:
        w = edge_weight
    msgs = w[:, None] * x[dst]
    return jax.ops.segment_sum(msgs, src, num_segments=x.shape[0])


if __name__ == "__main__":
    key = jax.random.PRNGKey(0)
    k1, k2, k3, k4 = jax.random.split(key, 4)

    N = 8    # number of simplices / nodes (in_channels = out_channels = 1)
    F = 1
    E = 16   # number of (co)boundary edges

    x = jax.random.normal(k1, (N, F), dtype=jnp.float32)
    edge_index = jnp.stack([
        jax.random.randint(k2, (E,), 0, N, dtype=jnp.int32),
        jax.random.randint(k3, (E,), 0, N, dtype=jnp.int32),
    ], axis=0)
    edge_weight = jax.random.normal(k4, (E,), dtype=jnp.float32)

    out = diffusion_step(x, edge_index, edge_weight)
    out = jax.block_until_ready(out)

    ref = _reference(x, edge_index, edge_weight)
    assert out.shape == (N, F)
    assert jnp.allclose(out, ref, atol=1e-5, rtol=1e-5)

    # Also exercise the edge_weight=None path (message() returns x_j unchanged).
    out_no_w = jax.block_until_ready(diffusion_step(x, edge_index, None))
    ref_no_w = _reference(x, edge_index, None)
    assert jnp.allclose(out_no_w, ref_no_w, atol=1e-5, rtol=1e-5)

    print("KERNEL_OK")
</pallas_src>

<mosaic_0001>
module attributes {stable_mosaic.version = 11 : i64} {
  func.func @_diffusion_step_kernel(%arg0: i32, %arg1: memref<2x128xi32, #tpu.memory_space<vmem>>, %arg2: memref<1x128xf32, #tpu.memory_space<vmem>>, %arg3: memref<8x128xf32, #tpu.memory_space<vmem>>, %arg4: memref<8x128xf32, #tpu.memory_space<vmem>>, %arg5: memref<8x128xf32, #tpu.memory_space<vmem>>) attributes {dimension_semantics = [#tpu.dimension_semantics<arbitrary>], iteration_bounds = array<i64: 1>, scalar_prefetch = 0 : i64, scratch_operands = 1 : i64, tpu.core_type = #tpu.core_type<tc>, window_params = [{transform_indices = @transform_0, window_bounds = array<i64: 2, 128>}, {transform_indices = @transform_1, window_bounds = array<i64: 1, 128>}, {pipeline_mode = #tpu.pipeline_mode<synchronous>, transform_indices = @transform_2, window_bounds = array<i64: 8, 128>}, {pipeline_mode = #tpu.pipeline_mode<synchronous>, transform_indices = @transform_3, window_bounds = array<i64: 8, 128>}]} {
    %c0_i32 = arith.constant 0 : i32
    %0 = arith.cmpi eq, %arg0, %c0_i32 : i32
    %1 = arith.extui %0 : i1 to i32
    %c0_i32_0 = arith.constant 0 : i32
    %2 = arith.cmpi ne, %1, %c0_i32_0 : i32
    scf.if %2 {
      %cst_15 = arith.constant 0.000000e+00 : f32
      %26 = vector.broadcast %cst_15 : f32 to vector<8x128xf32>
      %c0_16 = arith.constant 0 : index
      %c0_17 = arith.constant 0 : index
      %27 = vector.load %arg5[%c0_16, %c0_17] : memref<8x128xf32, #tpu.memory_space<vmem>>, vector<8x128xf32>
      tpu.vector_store %arg5[%c0_16, %c0_17], %26 {strides = array<i32>} : memref<8x128xf32, #tpu.memory_space<vmem>>, vector<8x128xf32>,
    } else {
    }
    %c0 = arith.constant 0 : index
    %c0_1 = arith.constant 0 : index
    %3 = vector.load %arg1[%c0, %c0_1] : memref<2x128xi32, #tpu.memory_space<vmem>>, vector<1x128xi32>
    %c1 = arith.constant 1 : index
    %c0_2 = arith.constant 0 : index
    %4 = vector.load %arg1[%c1, %c0_2] : memref<2x128xi32, #tpu.memory_space<vmem>>, vector<1x128xi32>
    %c0_3 = arith.constant 0 : index
    %c0_4 = arith.constant 0 : index
    %5 = vector.load %arg2[%c0_3, %c0_4] : memref<1x128xf32, #tpu.memory_space<vmem>>, vector<1x128xf32>
    %c0_5 = arith.constant 0 : index
    %c0_6 = arith.constant 0 : index
    %6 = vector.load %arg3[%c0_5, %c0_6] : memref<8x128xf32, #tpu.memory_space<vmem>>, vector<8x128xf32>
    %7 = tpu.iota {dimensions = array<i32: 0>} : vector<128x128xi32>
    %8 = vector.broadcast %4 : vector<1x128xi32> to vector<128x128xi32>
    %9 = arith.cmpi eq, %8, %7 : vector<128x128xi32>
    %cst = arith.constant 0.000000e+00 : f32
    %10 = vector.shape_cast %5 : vector<1x128xf32> to vector<1x128xf32>
    %11 = vector.broadcast %10 : vector<1x128xf32> to vector<128x128xf32>
    %12 = vector.broadcast %cst : f32 to vector<128x128xf32>
    %13 = arith.select %9, %11, %12 : vector<128x128xi1>, vector<128x128xf32>
    %cst_7 = arith.constant dense<0.000000e+00> : vector<8x128xf32>
    %14 = tpu.matmul %6, %13, %cst_7 {dimension_numbers = #tpu.dot_dimension_numbers<[1], [0], [0], [1], [0, 0, 1, 1], [], []>} : vector<8x128xf32>, vector<128x128xf32>, vector<8x128xf32> -> vector<8x128xf32>
    %15 = vector.broadcast %3 : vector<1x128xi32> to vector<128x128xi32>
    %16 = arith.cmpi eq, %15, %7 : vector<128x128xi32>
    %17 = arith.extui %16 : vector<128x128xi1> to vector<128x128xi32>
    %18 = arith.sitofp %17 : vector<128x128xi32> to vector<128x128xf32>
    %cst_8 = arith.constant dense<0.000000e+00> : vector<8x128xf32>
    %19 = tpu.matmul %14, %18, %cst_8 {dimension_numbers = #tpu.dot_dimension_numbers<[1], [1], [0], [0], [0, 0, 1, 0], [], []>} : vector<8x128xf32>, vector<128x128xf32>, vector<8x128xf32> -> vector<8x128xf32>
    %c0_9 = arith.constant 0 : index
    %c0_10 = arith.constant 0 : index
    %20 = vector.load %arg5[%c0_9, %c0_10] : memref<8x128xf32, #tpu.memory_space<vmem>>, vector<8x128xf32>
    %21 = arith.addf %20, %19 : vector<8x128xf32>
    %c0_11 = arith.constant 0 : index
    %c0_12 = arith.constant 0 : index
    %22 = vector.load %arg5[%c0_11, %c0_12] : memref<8x128xf32, #tpu.memory_space<vmem>>, vector<8x128xf32>
    tpu.vector_store %arg5[%c0_11, %c0_12], %21 {strides = array<i32>} : memref<8x128xf32, #tpu.memory_space<vmem>>, vector<8x128xf32>,
    %c0_i32_13 = arith.constant 0 : i32
    %23 = arith.cmpi eq, %arg0, %c0_i32_13 : i32
    %24 = arith.extui %23 : i1 to i32
    %c0_i32_14 = arith.constant 0 : i32
    %25 = arith.cmpi ne, %24, %c0_i32_14 : i32
    scf.if %25 {
      %c0_15 = arith.constant 0 : index
      %c0_16 = arith.constant 0 : index
      %26 = vector.load %arg5[%c0_15, %c0_16] : memref<8x128xf32, #tpu.memory_space<vmem>>, vector<8x128xf32>
      %c0_17 = arith.constant 0 : index
      %c0_18 = arith.constant 0 : index
      %27 = vector.load %arg4[%c0_17, %c0_18] : memref<8x128xf32, #tpu.memory_space<vmem>>, vector<8x128xf32>
      tpu.vector_store %arg4[%c0_17, %c0_18], %26 {strides = array<i32>} : memref<8x128xf32, #tpu.memory_space<vmem>>, vector<8x128xf32>,
    } else {
    }
    return
  }
  func.func @transform_0(%arg0: i32) -> (i32, i32) {
    %c0_i32 = arith.constant 0 : i32
    %c0_i32_0 = arith.constant 0 : i32
    return %c0_i32, %arg0 : i32, i32
  }
  func.func @transform_1(%arg0: i32) -> (i32, i32) {
    %c0_i32 = arith.constant 0 : i32
    %c0_i32_0 = arith.constant 0 : i32
    return %c0_i32, %arg0 : i32, i32
  }
  func.func @transform_2(%arg0: i32) -> (i32, i32) {
    %c0_i32 = arith.constant 0 : i32
    %c0_i32_0 = arith.constant 0 : i32
    %c0_i32_1 = arith.constant 0 : i32
    return %c0_i32, %c0_i32_0 : i32, i32
  }
  func.func @transform_3(%arg0: i32) -> (i32, i32) {
    %c0_i32 = arith.constant 0 : i32
    %c0_i32_0 = arith.constant 0 : i32
    %c0_i32_1 = arith.constant 0 : i32
    return %c0_i32, %c0_i32_0 : i32, i32
  }
}

</mosaic_0001>

<bundles_post_ra>
// kernel: tpu_custom_call.1
= control target key start
LH: loop header
LB: loop body
LE: loop exit
PB: predicated region body
PF: predicated region fallthrough
CT: control target
= control target key end

     0   :  { %8 = vsyncpa [#allocation4], 0  ;;  %s711_s0 = inlined_call_operand.hbm [shape: s32[2,128], index: 0, kind: input, shape index: {}]   ;;  %s712_s1 = inlined_call_operand.vmem [shape: f32[1,128], index: 1, kind: input, shape index: {}]   ;;  %s713_s2 = inlined_call_operand.hbm [shape: f32[8,128], index: 2, kind: input, shape index: {}]   ;;  %s714_s3 = inlined_call_operand.hbm [shape: f32[8,128], index: 3, kind: output, shape index: {}]  }
   0x1   :  { %9 = vsyncpa [#allocation7], 0 }
   0x2   :  { %10 = vsyncpa [#allocation5], 0  ;;  %s550_s12 = smov [#allocation3]   ;;  %s551_s14 = smov [#allocation6]  }
   0x3   :  { %s17_s13 = sshll.u32 %s550_s12, 4  ;;  %s29_s15 = sshll.u32 %s551_s14, 4  ;;  %s18_s13 = int_to_ptr.vmem [resolvable:$true] %s17_s13  ;;  %s30_s15 = int_to_ptr.vmem [resolvable:$true] %s29_s15 }
   0x4   :  { %s492_s16 = scalar_lea.vmem %s18_s13, 32  ;;  %p497_p1 = scmp.lt.s32.totalorder %s18_s13, %s18_s13 }
   0x5   :  { %p493_p0 = scmp.ne.s32.totalorder %s18_s13, %s492_s16  ;;  %p498_p2 = scmp.lt.s32.totalorder %s492_s16, %s492_s16 }
   0x7   :  { %p499_p3 = por %p498_p2, %p497_p1 }
   0x9   :  { %p500_p4 = pnand %p499_p3, %p493_p0 }
   0xb   :  { %503 = shalt.err (!%p500_p4)
}
   0xc   :  { %20 = dma.hbm_to_vmem [thread:$0]  %s711_s0, 32, %s18_s13, [#allocation4]  }
   0xd   :  { %s512_s19 = scalar_lea.vmem %s30_s15, 128  ;;  %p517_p6 = scmp.lt.s32.totalorder %s30_s15, %s30_s15 }
   0xe   :  { %p513_p5 = scmp.ne.s32.totalorder %s30_s15, %s512_s19  ;;  %p518_p7 = scmp.lt.s32.totalorder %s512_s19, %s512_s19 }
  0x10   :  { %p519_p8 = por %p518_p7, %p517_p6 }
  0x12   :  { %p520_p9 = pnand %p519_p8, %p513_p5 }
  0x14   :  { %523 = shalt.err (!%p520_p9)
}
  0x15   :  { %32 = dma.hbm_to_vmem [thread:$0]  %s713_s2, 128, %s30_s15, [#allocation7]  }
  0x16   :  { %544 = dma.done.wait [#allocation4], 32  }
  0x17   :  { %545 = vsyncadd [#allocation4], 4294967264 }
  0x18   :  { %546 = dma.done.wait [#allocation7], 128  }
  0x19   :  { %547 = vsyncadd [#allocation7], 4294967168  ;;  %v48_v0 = vlaneseq  ;;  %v552_v1 = vmov 0.0   ;;  %vm553_vm0 = vmmov 0   ;;  %v591_v6 = vld [vmem:[#allocation3 + $0x1] ss:$0 sm:$0xff] }
  0x1a   :  { %408 = vmatprep.subr.mxu0 %v552_v1  ;;  %440 = vmatprep.mubr.msk.f32.mxu0 %vm553_vm0, %v552_v1  ;;  %v596_v7 = vld [vmem:[%s712_s1] ss:$0 sm:$0xff]  ;;  %v554_v12 = vmov 1.0   ;;  %v47_v22 = vld [vmem:[#allocation6] sm:$0xff]  ;;  %s555_s1 = smov [#allocation8]  }
  0x1b   :  { %v584_v2 = vshrl.u32 %v48_v0, 7  ;;  %443 = vmatprep.subr.mxu1 %v552_v1  ;;  %475 = vmatprep.mubr.msk.f32.mxu1 %vm553_vm0, %v552_v1  ;;  %v601_v9 = vld [vmem:[#allocation3] ss:$0 sm:$0xff]  ;;  %s313_s22 = sshll.u32 %s555_s1, 4  ;;  %s314_s22 = int_to_ptr.vmem [resolvable:$true] %s313_s22 }
  0x1c   :  { %s524_s23 = scalar_lea.vmem %s314_s22, 128  ;;  %p529_p11 = scmp.lt.s32.totalorder %s314_s22, %s314_s22 }
  0x1d   :  { %v64_v3 = vadd.s32 120, %v584_v2  ;;  %v63_v4 = vadd.s32 112, %v584_v2  ;;  %v62_v5 = vadd.s32 104, %v584_v2  ;;  %v61_v8 = vadd.s32 96, %v584_v2  ;;  %p525_p10 = scmp.ne.s32.totalorder %s314_s22, %s524_s23  ;;  %p530_p12 = scmp.lt.s32.totalorder %s524_s23, %s524_s23 }
  0x1e   :  { %v60_v10 = vadd.s32 88, %v584_v2  ;;  %v59_v11 = vadd.s32 80, %v584_v2  ;;  %v58_v13 = vadd.s32 72, %v584_v2  ;;  %v57_v14 = vadd.s32 64, %v584_v2 }
  0x1f   :  { %vm84_vm1 = vcmp.eq.s32.totalorder %v591_v6, %v64_v3  ;;  %vm83_vm2 = vcmp.eq.s32.totalorder %v591_v6, %v63_v4  ;;  %vm82_vm3 = vcmp.eq.s32.totalorder %v591_v6, %v62_v5  ;;  %vm81_vm4 = vcmp.eq.s32.totalorder %v591_v6, %v61_v8  ;;  %p531_p13 = por %p530_p12, %p529_p11 }
  0x20   :  { %409 = vmatpush3.msk.msra.mxu0 %vm84_vm1, %v596_v7  ;;  %vm196_vm5 = vcmp.eq.s32.totalorder %v601_v9, %v64_v3  ;;  %vm80_vm6 = vcmp.eq.s32.totalorder %v591_v6, %v60_v10  ;;  %vm195_vm7 = vcmp.eq.s32.totalorder %v601_v9, %v63_v4  ;;  %vm79_vm8 = vcmp.eq.s32.totalorder %v591_v6, %v59_v11 }
  0x21   :  { %410 = vmatprep.subr.mxu0 %v552_v1  ;;  %444 = vmatpush3.xpose.msk.msra.mxu1 %vm196_vm5, %v554_v12  ;;  %vm78_vm9 = vcmp.eq.s32.totalorder %v591_v6, %v58_v13  ;;  %v56_v15 = vadd.s32 56, %v584_v2  ;;  %vm194_vm10 = vcmp.eq.s32.totalorder %v601_v9, %v62_v5  ;;  %vm77_vm11 = vcmp.eq.s32.totalorder %v591_v6, %v57_v14  ;;  %p532_p0 = pnand %p531_p13, %p525_p10 }
  0x22   :  { %411 = vmatpush3.msk.msra.mxu0 %vm83_vm2, %v596_v7  ;;  %445 = vmatprep.subr.mxu1 %v552_v1  ;;  %v55_v16 = vadd.s32 48, %v584_v2  ;;  %v54_v17 = vadd.s32 40, %v584_v2  ;;  %vm193_vm13 = vcmp.eq.s32.totalorder %v601_v9, %v61_v8  ;;  %v53_v18 = vadd.s32 32, %v584_v2 }
  0x23   :  { %412 = vmatprep.subr.mxu0 %v552_v1  ;;  %vm76_vm12 = vcmp.eq.s32.totalorder %v591_v6, %v56_v15  ;;  %v52_v19 = vadd.s32 24, %v584_v2  ;;  %vm192_vm0 = vcmp.eq.s32.totalorder %v601_v9, %v60_v10  ;;  %v51_v20 = vadd.s32 16, %v584_v2 }
  0x24   :  { %413 = vmatpush3.msk.msra.mxu0 %vm82_vm3, %v596_v7  ;;  %vm75_vm14 = vcmp.eq.s32.totalorder %v591_v6, %v55_v16  ;;  %vm74_vm15 = vcmp.eq.s32.totalorder %v591_v6, %v54_v17  ;;  %vm73_vm1 = vcmp.eq.s32.totalorder %v591_v6, %v53_v18  ;;  %v50_v21 = vadd.s32 8, %v584_v2 }
  0x25   :  { %414 = vmatprep.subr.mxu0 %v552_v1  ;;  %446 = vmatpush3.xpose.msk.msra.mxu1 %vm195_vm7, %v554_v12  ;;  %vm72_vm2 = vcmp.eq.s32.totalorder %v591_v6, %v52_v19  ;;  %vm191_vm3 = vcmp.eq.s32.totalorder %v601_v9, %v59_v11  ;;  %vm69_vm7 = vcmp.eq.s32.totalorder %v591_v6, %v584_v2 }
  0x26   :  { %415 = vmatpush3.msk.msra.mxu0 %vm81_vm4, %v596_v7  ;;  %447 = vmatprep.subr.mxu1 %v552_v1  ;;  %vm71_vm4 = vcmp.eq.s32.totalorder %v591_v6, %v51_v20  ;;  %vm70_vm5 = vcmp.eq.s32.totalorder %v591_v6, %v50_v21 }
  0x27   :  { %416 = vmatprep.subr.mxu0 %v552_v1 }
  0x28   :  { %417 = vmatpush3.msk.msra.mxu0 %vm80_vm6, %v596_v7  ;;  %vm190_vm6 = vcmp.eq.s32.totalorder %v601_v9, %v58_v13 }
  0x29   :  { %418 = vmatprep.subr.mxu0 %v552_v1  ;;  %448 = vmatpush3.xpose.msk.msra.mxu1 %vm194_vm10, %v554_v12  ;;  %vm187_vm10 = vcmp.eq.s32.totalorder %v601_v9, %v55_v16 }
  0x2a   :  { %419 = vmatpush3.msk.msra.mxu0 %vm79_vm8, %v596_v7  ;;  %449 = vmatprep.subr.mxu1 %v552_v1  ;;  %vm189_vm8 = vcmp.eq.s32.totalorder %v601_v9, %v57_v14 }
  0x2b   :  { %420 = vmatprep.subr.mxu0 %v552_v1 }
  0x2c   :  { %421 = vmatpush3.msk.msra.mxu0 %vm78_vm9, %v596_v7  ;;  %vm188_vm9 = vcmp.eq.s32.totalorder %v601_v9, %v56_v15 }
  0x2d   :  { %422 = vmatprep.subr.mxu0 %v552_v1  ;;  %450 = vmatpush3.xpose.msk.msra.mxu1 %vm193_vm13, %v554_v12  ;;  %vm184_vm13 = vcmp.eq.s32.totalorder %v601_v9, %v52_v19 }
  0x2e   :  { %423 = vmatpush3.msk.msra.mxu0 %vm77_vm11, %v596_v7  ;;  %451 = vmatprep.subr.mxu1 %v552_v1  ;;  %vm186_vm11 = vcmp.eq.s32.totalorder %v601_v9, %v54_v17 }
  0x2f   :  { %424 = vmatprep.subr.mxu0 %v552_v1 }
  0x30   :  { %425 = vmatpush3.msk.msra.mxu0 %vm76_vm12, %v596_v7  ;;  %vm185_vm12 = vcmp.eq.s32.totalorder %v601_v9, %v53_v18 }
  0x31   :  { %426 = vmatprep.subr.mxu0 %v552_v1  ;;  %452 = vmatpush3.xpose.msk.msra.mxu1 %vm192_vm0, %v554_v12  ;;  %vm181_vm0 = vcmp.eq.s32.totalorder %v601_v9, %v584_v2 }
  0x32   :  { %427 = vmatpush3.msk.msra.mxu0 %vm75_vm14, %v596_v7  ;;  %453 = vmatprep.subr.mxu1 %v552_v1  ;;  %vm183_vm14 = vcmp.eq.s32.totalorder %v601_v9, %v51_v20 }
  0x33   :  { %428 = vmatprep.subr.mxu0 %v552_v1 }
  0x34   :  { %429 = vmatpush3.msk.msra.mxu0 %vm74_vm15, %v596_v7  ;;  %vm182_vm15 = vcmp.eq.s32.totalorder %v601_v9, %v50_v21 }
  0x35   :  { %430 = vmatprep.subr.mxu0 %v552_v1  ;;  %454 = vmatpush3.xpose.msk.msra.mxu1 %vm191_vm3, %v554_v12 }
  0x36   :  { %431 = vmatpush3.msk.msra.mxu0 %vm73_vm1, %v596_v7  ;;  %455 = vmatprep.subr.mxu1 %v552_v1 }
  0x37   :  { %432 = vmatprep.subr.mxu0 %v552_v1 }
  0x38   :  { %433 = vmatpush3.msk.msra.mxu0 %vm72_vm2, %v596_v7 }
  0x39   :  { %434 = vmatprep.subr.mxu0 %v552_v1  ;;  %456 = vmatpush3.xpose.msk.msra.mxu1 %vm190_vm6, %v554_v12 }
  0x3a   :  { %435 = vmatpush3.msk.msra.mxu0 %vm71_vm4, %v596_v7  ;;  %457 = vmatprep.subr.mxu1 %v552_v1 }
  0x3b   :  { %436 = vmatprep.subr.mxu0 %v552_v1 }
  0x3c   :  { %437 = vmatpush3.msk.msra.mxu0 %vm70_vm5, %v596_v7 }
  0x3d   :  { %438 = vmatprep.subr.mxu0 %v552_v1  ;;  %458 = vmatpush3.xpose.msk.msra.mxu1 %vm189_vm8, %v554_v12 }
  0x3e   :  { %439 = vmatpush3.msk.msra.mxu0 %vm69_vm7, %v596_v7  ;;  %459 = vmatprep.subr.mxu1 %v552_v1 }
  0x3f   :  { %441 = vmatmul.mubr.f32.vlgmr.msra.gmra.mxu0 %v47_v22 }
  0x41   :  { %460 = vmatpush3.xpose.msk.msra.mxu1 %vm188_vm9, %v554_v12 }
  0x42   :  { %461 = vmatprep.subr.mxu1 %v552_v1 }
  0x45   :  { %462 = vmatpush3.xpose.msk.msra.mxu1 %vm187_vm10, %v554_v12 }
  0x46   :  { %463 = vmatprep.subr.mxu1 %v552_v1 }
  0x49   :  { %464 = vmatpush3.xpose.msk.msra.mxu1 %vm186_vm11, %v554_v12 }
  0x4a   :  { %465 = vmatprep.subr.mxu1 %v552_v1 }
  0x4d   :  { %466 = vmatpush3.xpose.msk.msra.mxu1 %vm185_vm12, %v554_v12 }
  0x4e   :  { %467 = vmatprep.subr.mxu1 %v552_v1 }
  0x51   :  { %468 = vmatpush3.xpose.msk.msra.mxu1 %vm184_vm13, %v554_v12 }
  0x52   :  { %469 = vmatprep.subr.mxu1 %v552_v1 }
  0x55   :  { %470 = vmatpush3.xpose.msk.msra.mxu1 %vm183_vm14, %v554_v12 }
  0x56   :  { %471 = vmatprep.subr.mxu1 %v552_v1 }
  0x59   :  { %472 = vmatpush3.xpose.msk.msra.mxu1 %vm182_vm15, %v554_v12 }
  0x5a   :  { %473 = vmatprep.subr.mxu1 %v552_v1 }
  0x5d   :  { %474 = vmatpush3.xpose.msk.msra.mxu1 %vm181_vm0, %v554_v12 }
  0xff   :  { %v173_v23 = vpop.f32.mrf.mxu0 }
 0x100   :  { %476 = vmatmul.mubr.f32.vlgmr.msra.gmra.mxu1 %v173_v23 }
 0x101   :  { %v442_v24 = vpop.f32.mrf.mxu0 }
 0x1c0   :  { %v295_v25 = vpop.f32.mrf.mxu1 }
 0x1c1   :  { %306 = vst [vmem:[#allocation8] sm:$0xff] %v295_v25 }
 0x1c2   :  { %v477_v26 = vpop.f32.mrf.mxu1 }
 0x1c3   :  { %535 = shalt.err (!%p532_p0)
}
 0x1c4   :  { %316 = dma.vmem_to_hbm [thread:$0]  %s314_s22, 128, %s714_s3, [#allocation5]  }
 0x1c5   :  { %548 = dma.done.wait [#allocation5], 128  }
 0x1c6   :  { %549 = vsyncadd [#allocation5], 4294967168 }
 0x1c7   :  { %320 = vsyncpa [#allocation4], 1 }
 0x1c8   :  { %321 = vsyncpa [#allocation7], 1 }
 0x1c9   :  { %322 = vsyncpa [#allocation5], 1 }

</bundles_post_ra>
